<compile_context>
chip_gen: v7x
topology: tpu7x:2x2x1
jax: 0.10.0
libtpu: 0.0.40
codegen_flags: <defaults>
</compile_context>

<pallas_src>
import functools

import jax
import jax.numpy as jnp
from jax.experimental import pallas as pl
from jax.experimental.pallas import tpu as pltpu


def _pdconv_kernel(x_ref, m_ref, o_ref, *, H, W, k):
    """Masked kxk neighborhood max on a flattened-spatial channel tile.

    x_ref : (TC, H*W)   input features (unpadded; halo synthesized here)
    m_ref : (k*k, H*W)  group mask, int8 (0 => exclude)
    o_ref : (TC, H*W)   output
    """
    HW = H * W
    r = k // 2
    x = x_ref[...]                       # (TC, HW)
    dt = x.dtype
    tc = x.shape[0]

    # Hoisted out of the tap loop: mask bits + per-lane column index
    # (column index is needed to kill the row-wrap lanes of horizontal shifts).
    mbits = m_ref[...] != 0                                        # (k*k, HW) bool
    w_pos = jax.lax.broadcasted_iota(jnp.int32, (1, HW), 1) % W    # (1, HW)

    acc = None
    for dh in range(k):
        for dw in range(k):
            idx = dh * k + dw
            dho, dwo = dh - r, dw - r
            s = dho * W + dwo            # flattened offset: tap[p] = x[p + s]

            # Shifted copy with zero fill at the flat ends.  The zero fill
            # implements the vertical (H) zero padding exactly; horizontal
            # out-of-bounds lanes wrap to the neighboring row and are removed
            # by the w-validity mask below.
            if s == 0:
                xs = x
            elif s > 0:
                xs = jnp.concatenate([x[:, s:], jnp.zeros((tc, s), dt)], axis=1)
            else:
                xs = jnp.concatenate([jnp.zeros((tc, -s), dt), x[:, :s]], axis=1)

            mrow = mbits[idx:idx + 1, :]                            # (1, HW)
            if dwo < 0:
                mrow = jnp.logical_and(mrow, w_pos >= -dwo)         # w + dwo >= 0
            elif dwo > 0:
                mrow = jnp.logical_and(mrow, w_pos < W - dwo)       # w + dwo < W

            val = xs * mrow.astype(dt)          # feat * mask (matches PyTorch)
            acc = val if acc is None else jnp.maximum(acc, val)

    o_ref[...] = acc


def _choose_channel_tile(C, HW, itemsize, target_bytes=2 << 20):
    """Largest channel tile dividing C, multiple of 8 (unless == C), that keeps
    one x tile within ~target_bytes of VMEM."""
    if C * HW * itemsize <= target_bytes or C % 8 != 0:
        return C
    candidates = [tc for tc in range(8, C + 1, 8)
                  if C % tc == 0 and tc * HW * itemsize <= target_bytes]
    return max(candidates) if candidates else 8


def pdconv_forward(x_pre, x, group_mask, *, kernel_size=3, padding=1, factor=1,
                   channel_tile_bytes=2 << 20):
    """JAX/Pallas equivalent of PDConv.forward(x_pre, x, group_mask)."""
    assert padding == kernel_size // 2, "kernel assumes 'same' geometry (PDConv default k=3, pad=1)"
    x = jnp.asarray(x)
    group_mask = jnp.asarray(group_mask)

    # ---- PUpsample (glue): zero-interleaved upsample ------------------------
    if factor != 1:
        N, C0, Hin, Win = x.shape
        up = jnp.zeros((N, C0, Hin * factor, Win * factor), dtype=x.dtype)
        up = up.at[:, :, ::factor, ::factor].set(x)
        x = up

    B, C, H, W = x.shape
    kk = kernel_size * kernel_size
    assert group_mask.shape == (B, kk, H, W), group_mask.shape

    # ---- flatten spatial dims (free reshape) so the lane axis is H*W --------
    HW = H * W
    x_flat = x.reshape(B, C, HW)
    # int8 mask: 4x less HBM/VMEM traffic than f32.  (In a real pipeline the
    # caller should hand the mask over as int8/bool directly.)
    m_flat = (group_mask != 0).astype(jnp.int8).reshape(B, kk, HW)

    TC = _choose_channel_tile(C, HW, x.dtype.itemsize, channel_tile_bytes)
    n_ct = C // TC

    kernel = functools.partial(_pdconv_kernel, H=H, W=W, k=kernel_size)

    # VMEM budget hint: 2x-buffered (x tile + mask tile + out tile) plus a few
    # tile-sized temporaries for the shifted copies / accumulator.  Capped well
    # below v7x's 64 MiB physical VMEM.
    tile_b = TC * HW * x.dtype.itemsize
    est_vmem = 2 * (2 * tile_b + kk * HW) + 8 * tile_b
    vmem_limit = int(min(max(est_vmem, 16 << 20), 60 << 20))

    out_flat = pl.pallas_call(
        kernel,
        out_shape=jax.ShapeDtypeStruct((B, C, HW), x.dtype),
        grid_spec=pltpu.PrefetchScalarGridSpec(
            num_scalar_prefetch=0,
            grid=(B, n_ct),   # channel-tile axis innermost: mask block index is
                              # constant across it, so the mask is DMA'd once per batch
            in_specs=[
                pl.BlockSpec((pl.Squeezed(), TC, HW), lambda b, c: (b, c, 0)),
                pl.BlockSpec((pl.Squeezed(), kk, HW), lambda b, c: (b, 0, 0)),
            ],
            out_specs=pl.BlockSpec((pl.Squeezed(), TC, HW), lambda b, c: (b, c, 0)),
        ),
        compiler_params=pltpu.CompilerParams(
            dimension_semantics=("parallel", "parallel"),
            vmem_limit_bytes=vmem_limit,
        ),
    )(x_flat, m_flat)

    out = out_flat.reshape(B, C, H, W)

    # ---- concat with x_pre along channel axis (glue) -------------------------
    if x_pre is not None:
        out = jnp.concatenate([out, jnp.asarray(x_pre)], axis=1)
    return out


def pdconv_ref(x_pre, x, group_mask, kernel_size=3, padding=1, factor=1):
    """Pure-JAX reference (mirrors the PyTorch unfold/mask/max path)."""
    if factor != 1:
        N, C, Hin, Win = x.shape
        up = jnp.zeros((N, C, Hin * factor, Win * factor), dtype=x.dtype)
        up = up.at[:, :, ::factor, ::factor].set(x)
        x = up
    B, C, H, W = x.shape
    xpad = jnp.pad(x, ((0, 0), (0, 0), (padding, padding), (padding, padding)))
    patches = jnp.stack(
        [xpad[:, :, dh:dh + H, dw:dw + W]
         for dh in range(kernel_size) for dw in range(kernel_size)],
        axis=2,
    )  # (B, C, k*k, H, W)
    m = (group_mask != 0).astype(x.dtype)[:, None]  # (B, 1, k*k, H, W)
    out = jnp.max(patches * m, axis=2)
    if x_pre is not None:
        out = jnp.concatenate([out, x_pre], axis=1)
    return out


if __name__ == "__main__":
    key = jax.random.PRNGKey(0)
    k1, k2, k3 = jax.random.split(key, 3)

    B, C, H, W = 2, 4, 16, 16
    C_PRE = 4
    KSIZE, PADDING, FACTOR = 3, 1, 1

    x = jax.random.normal(k1, (B, C, H, W), dtype=jnp.float32)
    x_pre = jax.random.normal(k2, (B, C_PRE, H, W), dtype=jnp.float32)
    group_mask = (jax.random.uniform(k3, (B, KSIZE * KSIZE, H, W)) > 0.3).astype(jnp.float32)

    out = pdconv_forward(x_pre, x, group_mask,
                         kernel_size=KSIZE, padding=PADDING, factor=FACTOR)
    out = jax.block_until_ready(out)

    ref = pdconv_ref(x_pre, x, group_mask,
                     kernel_size=KSIZE, padding=PADDING, factor=FACTOR)

    assert out.shape == (B, C + C_PRE, H, W), out.shape
    assert jnp.allclose(out, ref, atol=1e-5), float(jnp.max(jnp.abs(out - ref)))
    print("KERNEL_OK")
</pallas_src>

<mosaic_0001>
module attributes {stable_mosaic.version = 11 : i64} {
  func.func @_pdconv_kernel(%arg0: i32, %arg1: i32, %arg2: memref<1x4x256xf32, #tpu.memory_space<vmem>>, %arg3: memref<1x9x256xi8, #tpu.memory_space<vmem>>, %arg4: memref<1x4x256xf32, #tpu.memory_space<vmem>>) attributes {dimension_semantics = [#tpu.dimension_semantics<parallel>, #tpu.dimension_semantics<parallel>], iteration_bounds = array<i64: 2, 1>, scalar_prefetch = 0 : i64, scratch_operands = 0 : i64, tpu.core_type = #tpu.core_type<tc>, window_params = [{transform_indices = @transform_0, window_bounds = array<i64: 1, 4, 256>}, {transform_indices = @transform_1, window_bounds = array<i64: 1, 9, 256>}, {transform_indices = @transform_2, window_bounds = array<i64: 1, 4, 256>}]} {
    %c0 = arith.constant 0 : index
    %c0_0 = arith.constant 0 : index
    %c0_1 = arith.constant 0 : index
    %0 = vector.load %arg2[%c0, %c0_0, %c0_1] : memref<1x4x256xf32, #tpu.memory_space<vmem>>, vector<1x4x256xf32>
    %1 = vector.shape_cast %0 : vector<1x4x256xf32> to vector<4x256xf32>
    %c0_2 = arith.constant 0 : index
    %c0_3 = arith.constant 0 : index
    %c0_4 = arith.constant 0 : index
    %2 = vector.load %arg3[%c0_2, %c0_3, %c0_4] : memref<1x9x256xi8, #tpu.memory_space<vmem>>, vector<1x9x256xi8>
    %3 = vector.shape_cast %2 : vector<1x9x256xi8> to vector<9x256xi8>
    %c0_i8 = arith.constant 0 : i8
    %4 = vector.broadcast %c0_i8 : i8 to vector<9x256xi8>
    %5 = arith.cmpi ne, %3, %4 : vector<9x256xi8>
    %6 = tpu.iota {dimensions = array<i32: 1>} : vector<1x256xi32>
    %c16_i32 = arith.constant 16 : i32
    %c0_i32 = arith.constant 0 : i32
    %7 = arith.cmpi eq, %c16_i32, %c0_i32 : i32
    %c1_i32 = arith.constant 1 : i32
    %8 = arith.select %7, %c1_i32, %c16_i32 : i32
    %9 = vector.broadcast %8 : i32 to vector<1x256xi32>
    %10 = arith.remsi %6, %9 : vector<1x256xi32>
    %c0_i32_5 = arith.constant 0 : i32
    %11 = vector.broadcast %c0_i32_5 : i32 to vector<1x256xi32>
    %12 = arith.cmpi ne, %10, %11 : vector<1x256xi32>
    %c0_i32_6 = arith.constant 0 : i32
    %13 = vector.broadcast %c0_i32_6 : i32 to vector<1x256xi32>
    %14 = arith.cmpi slt, %10, %13 : vector<1x256xi32>
    %c0_i32_7 = arith.constant 0 : i32
    %15 = arith.cmpi slt, %8, %c0_i32_7 : i32
    %16 = vector.broadcast %15 : i1 to vector<1x256xi1>
    %17 = vector.broadcast %16 : vector<1x256xi1> to vector<1x256xi1>
    %18 = arith.xori %14, %17 : vector<1x256xi1>
    %19 = arith.andi %18, %12 : vector<1x256xi1>
    %20 = vector.broadcast %8 : i32 to vector<1x256xi32>
    %21 = arith.addi %10, %20 : vector<1x256xi32>
    %22 = arith.select %19, %21, %10 : vector<1x256xi1>, vector<1x256xi32>
    %cst = arith.constant 0.000000e+00 : f32
    %23 = vector.broadcast %cst : f32 to vector<4x17xf32>
    %24 = vector.extract_strided_slice %1 {offsets = [0, 0], sizes = [4, 239], strides = [1, 1]} : vector<4x256xf32> to vector<4x239xf32>
    %25 = tpu.concatenate %23, %24 in 1 : vector<4x17xf32>, vector<4x239xf32> -> vector<4x256xf32>
    %26 = vector.extract_strided_slice %5 {offsets = [0, 0], sizes = [1, 256], strides = [1, 1]} : vector<9x256xi1> to vector<1x256xi1>
    %c1_i32_8 = arith.constant 1 : i32
    %27 = vector.broadcast %c1_i32_8 : i32 to vector<1x256xi32>
    %28 = arith.cmpi sge, %22, %27 : vector<1x256xi32>
    %29 = arith.andi %26, %28 : vector<1x256xi1>
    %30 = arith.extui %29 : vector<1x256xi1> to vector<1x256xi32>
    %31 = arith.sitofp %30 : vector<1x256xi32> to vector<1x256xf32>
    %32 = vector.broadcast %31 : vector<1x256xf32> to vector<4x256xf32>
    %33 = arith.mulf %25, %32 : vector<4x256xf32>
    %cst_9 = arith.constant 0.000000e+00 : f32
    %34 = vector.broadcast %cst_9 : f32 to vector<4x16xf32>
    %35 = vector.extract_strided_slice %1 {offsets = [0, 0], sizes = [4, 240], strides = [1, 1]} : vector<4x256xf32> to vector<4x240xf32>
    %36 = tpu.concatenate %34, %35 in 1 : vector<4x16xf32>, vector<4x240xf32> -> vector<4x256xf32>
    %37 = vector.extract_strided_slice %5 {offsets = [1, 0], sizes = [1, 256], strides = [1, 1]} : vector<9x256xi1> to vector<1x256xi1>
    %38 = arith.extui %37 : vector<1x256xi1> to vector<1x256xi32>
    %39 = arith.sitofp %38 : vector<1x256xi32> to vector<1x256xf32>
    %40 = vector.broadcast %39 : vector<1x256xf32> to vector<4x256xf32>
    %41 = arith.mulf %36, %40 : vector<4x256xf32>
    %42 = arith.maximumf %33, %41 : vector<4x256xf32>
    %cst_10 = arith.constant 0.000000e+00 : f32
    %43 = vector.broadcast %cst_10 : f32 to vector<4x15xf32>
    %44 = vector.extract_strided_slice %1 {offsets = [0, 0], sizes = [4, 241], strides = [1, 1]} : vector<4x256xf32> to vector<4x241xf32>
    %45 = tpu.concatenate %43, %44 in 1 : vector<4x15xf32>, vector<4x241xf32> -> vector<4x256xf32>
    %46 = vector.extract_strided_slice %5 {offsets = [2, 0], sizes = [1, 256], strides = [1, 1]} : vector<9x256xi1> to vector<1x256xi1>
    %c15_i32 = arith.constant 15 : i32
    %47 = vector.broadcast %c15_i32 : i32 to vector<1x256xi32>
    %48 = arith.cmpi slt, %22, %47 : vector<1x256xi32>
    %49 = arith.andi %46, %48 : vector<1x256xi1>
    %50 = arith.extui %49 : vector<1x256xi1> to vector<1x256xi32>
    %51 = arith.sitofp %50 : vector<1x256xi32> to vector<1x256xf32>
    %52 = vector.broadcast %51 : vector<1x256xf32> to vector<4x256xf32>
    %53 = arith.mulf %45, %52 : vector<4x256xf32>
    %54 = arith.maximumf %42, %53 : vector<4x256xf32>
    %cst_11 = arith.constant 0.000000e+00 : f32
    %55 = vector.broadcast %cst_11 : f32 to vector<4x1xf32>
    %56 = vector.extract_strided_slice %1 {offsets = [0, 0], sizes = [4, 255], strides = [1, 1]} : vector<4x256xf32> to vector<4x255xf32>
    %57 = tpu.concatenate %55, %56 in 1 : vector<4x1xf32>, vector<4x255xf32> -> vector<4x256xf32>
    %58 = vector.extract_strided_slice %5 {offsets = [3, 0], sizes = [1, 256], strides = [1, 1]} : vector<9x256xi1> to vector<1x256xi1>
    %c1_i32_12 = arith.constant 1 : i32
    %59 = vector.broadcast %c1_i32_12 : i32 to vector<1x256xi32>
    %60 = arith.cmpi sge, %22, %59 : vector<1x256xi32>
    %61 = arith.andi %58, %60 : vector<1x256xi1>
    %62 = arith.extui %61 : vector<1x256xi1> to vector<1x256xi32>
    %63 = arith.sitofp %62 : vector<1x256xi32> to vector<1x256xf32>
    %64 = vector.broadcast %63 : vector<1x256xf32> to vector<4x256xf32>
    %65 = arith.mulf %57, %64 : vector<4x256xf32>
    %66 = arith.maximumf %54, %65 : vector<4x256xf32>
    %67 = vector.extract_strided_slice %5 {offsets = [4, 0], sizes = [1, 256], strides = [1, 1]} : vector<9x256xi1> to vector<1x256xi1>
    %68 = arith.extui %67 : vector<1x256xi1> to vector<1x256xi32>
    %69 = arith.sitofp %68 : vector<1x256xi32> to vector<1x256xf32>
    %70 = vector.broadcast %69 : vector<1x256xf32> to vector<4x256xf32>
    %71 = arith.mulf %1, %70 : vector<4x256xf32>
    %72 = arith.maximumf %66, %71 : vector<4x256xf32>
    %73 = vector.extract_strided_slice %1 {offsets = [0, 1], sizes = [4, 255], strides = [1, 1]} : vector<4x256xf32> to vector<4x255xf32>
    %cst_13 = arith.constant 0.000000e+00 : f32
    %74 = vector.broadcast %cst_13 : f32 to vector<4x1xf32>
    %75 = tpu.concatenate %73, %74 in 1 : vector<4x255xf32>, vector<4x1xf32> -> vector<4x256xf32>
    %76 = vector.extract_strided_slice %5 {offsets = [5, 0], sizes = [1, 256], strides = [1, 1]} : vector<9x256xi1> to vector<1x256xi1>
    %c15_i32_14 = arith.constant 15 : i32
    %77 = vector.broadcast %c15_i32_14 : i32 to vector<1x256xi32>
    %78 = arith.cmpi slt, %22, %77 : vector<1x256xi32>
    %79 = arith.andi %76, %78 : vector<1x256xi1>
    %80 = arith.extui %79 : vector<1x256xi1> to vector<1x256xi32>
    %81 = arith.sitofp %80 : vector<1x256xi32> to vector<1x256xf32>
    %82 = vector.broadcast %81 : vector<1x256xf32> to vector<4x256xf32>
    %83 = arith.mulf %75, %82 : vector<4x256xf32>
    %84 = arith.maximumf %72, %83 : vector<4x256xf32>
    %85 = vector.extract_strided_slice %1 {offsets = [0, 15], sizes = [4, 241], strides = [1, 1]} : vector<4x256xf32> to vector<4x241xf32>
    %cst_15 = arith.constant 0.000000e+00 : f32
    %86 = vector.broadcast %cst_15 : f32 to vector<4x15xf32>
    %87 = tpu.concatenate %85, %86 in 1 : vector<4x241xf32>, vector<4x15xf32> -> vector<4x256xf32>
    %88 = vector.extract_strided_slice %5 {offsets = [6, 0], sizes = [1, 256], strides = [1, 1]} : vector<9x256xi1> to vector<1x256xi1>
    %c1_i32_16 = arith.constant 1 : i32
    %89 = vector.broadcast %c1_i32_16 : i32 to vector<1x256xi32>
    %90 = arith.cmpi sge, %22, %89 : vector<1x256xi32>
    %91 = arith.andi %88, %90 : vector<1x256xi1>
    %92 = arith.extui %91 : vector<1x256xi1> to vector<1x256xi32>
    %93 = arith.sitofp %92 : vector<1x256xi32> to vector<1x256xf32>
    %94 = vector.broadcast %93 : vector<1x256xf32> to vector<4x256xf32>
    %95 = arith.mulf %87, %94 : vector<4x256xf32>
    %96 = arith.maximumf %84, %95 : vector<4x256xf32>
    %97 = vector.extract_strided_slice %1 {offsets = [0, 16], sizes = [4, 240], strides = [1, 1]} : vector<4x256xf32> to vector<4x240xf32>
    %cst_17 = arith.constant 0.000000e+00 : f32
    %98 = vector.broadcast %cst_17 : f32 to vector<4x16xf32>
    %99 = tpu.concatenate %97, %98 in 1 : vector<4x240xf32>, vector<4x16xf32> -> vector<4x256xf32>
    %100 = vector.extract_strided_slice %5 {offsets = [7, 0], sizes = [1, 256], strides = [1, 1]} : vector<9x256xi1> to vector<1x256xi1>
    %101 = arith.extui %100 : vector<1x256xi1> to vector<1x256xi32>
    %102 = arith.sitofp %101 : vector<1x256xi32> to vector<1x256xf32>
    %103 = vector.broadcast %102 : vector<1x256xf32> to vector<4x256xf32>
    %104 = arith.mulf %99, %103 : vector<4x256xf32>
    %105 = arith.maximumf %96, %104 : vector<4x256xf32>
    %106 = vector.extract_strided_slice %1 {offsets = [0, 17], sizes = [4, 239], strides = [1, 1]} : vector<4x256xf32> to vector<4x239xf32>
    %cst_18 = arith.constant 0.000000e+00 : f32
    %107 = vector.broadcast %cst_18 : f32 to vector<4x17xf32>
    %108 = tpu.concatenate %106, %107 in 1 : vector<4x239xf32>, vector<4x17xf32> -> vector<4x256xf32>
    %109 = vector.extract_strided_slice %5 {offsets = [8, 0], sizes = [1, 256], strides = [1, 1]} : vector<9x256xi1> to vector<1x256xi1>
    %c15_i32_19 = arith.constant 15 : i32
    %110 = vector.broadcast %c15_i32_19 : i32 to vector<1x256xi32>
    %111 = arith.cmpi slt, %22, %110 : vector<1x256xi32>
    %112 = arith.andi %109, %111 : vector<1x256xi1>
    %113 = arith.extui %112 : vector<1x256xi1> to vector<1x256xi32>
    %114 = arith.sitofp %113 : vector<1x256xi32> to vector<1x256xf32>
    %115 = vector.broadcast %114 : vector<1x256xf32> to vector<4x256xf32>
    %116 = arith.mulf %108, %115 : vector<4x256xf32>
    %117 = arith.maximumf %105, %116 : vector<4x256xf32>
    %c0_20 = arith.constant 0 : index
    %c0_21 = arith.constant 0 : index
    %c0_22 = arith.constant 0 : index
    %118 = vector.load %arg4[%c0_20, %c0_21, %c0_22] : memref<1x4x256xf32, #tpu.memory_space<vmem>>, vector<1x4x256xf32>
    %119 = vector.shape_cast %118 : vector<1x4x256xf32> to vector<4x256xf32>
    %120 = vector.shape_cast %117 : vector<4x256xf32> to vector<1x4x256xf32>
    tpu.vector_store %arg4[%c0_20, %c0_21, %c0_22], %120 {strides = array<i32>} : memref<1x4x256xf32, #tpu.memory_space<vmem>>, vector<1x4x256xf32>,
    return
  }
  func.func @transform_0(%arg0: i32, %arg1: i32) -> (i32, i32, i32) {
    %c0_i32 = arith.constant 0 : i32
    %c0_i32_0 = arith.constant 0 : i32
    return %arg0, %arg1, %c0_i32 : i32, i32, i32
  }
  func.func @transform_1(%arg0: i32, %arg1: i32) -> (i32, i32, i32) {
    %c0_i32 = arith.constant 0 : i32
    %c0_i32_0 = arith.constant 0 : i32
    %c0_i32_1 = arith.constant 0 : i32
    return %arg0, %c0_i32, %c0_i32_0 : i32, i32, i32
  }
  func.func @transform_2(%arg0: i32, %arg1: i32) -> (i32, i32, i32) {
    %c0_i32 = arith.constant 0 : i32
    %c0_i32_0 = arith.constant 0 : i32
    return %arg0, %arg1, %c0_i32 : i32, i32, i32
  }
}

</mosaic_0001>

<bundles_post_ra>
// kernel: tpu_custom_call.1
= control target key start
LH: loop header
LB: loop body
LE: loop exit
PB: predicated region body
PF: predicated region fallthrough
CT: control target
= control target key end

     0   :  { %7 = vsyncpa [#allocation3], 0  ;;  %s1344_s0 = inlined_call_operand.hbm [shape: f32[2,4,256], index: 0, kind: input, shape index: {}]   ;;  %s1345_s1 = inlined_call_operand.hbm [shape: s8[2,9,256], index: 1, kind: input, shape index: {}]   ;;  %s1346_s2 = inlined_call_operand.hbm [shape: f32[2,4,256], index: 2, kind: output, shape index: {}]  }
   0x1   :  { %9 = vsyncpa [#allocation3 + $0x1], 0 }
   0x2   :  { %10 = vsyncpa [#allocation6], 0 }
   0x3   :  { %12 = vsyncpa [#allocation6 + $0x1], 0 }
   0x4   :  { %13 = vsyncpa [#allocation4], 0 }
   0x5   :  { %15 = vsyncpa [#allocation4 + $0x1], 0  ;;  %s964_s9 = smov 0   ;;  %s966_s10 = smov 0  }
   0x6   :  { %s968_s11 = smov 0   ;;  %s970_s12 = smov 0  }
   0x7   :  { %s972_s13 = smov 0   ;;  %s974_s14 = smov 0  }
   0x8 LB: > { %s666_s15 = sadd.s32 4294967295, %s932_s14   ;;  %s667_s16 = sadd.s32 4294967294, %s932_s14   ;;  %s932_s14 = sphi %s974_s14, %s21_s14   ;;  %s928_s13 = sphi %s972_s13, %s1377_s13   ;;  %s924_s12 = sphi %s970_s12, %s1376_s12   ;;  %s920_s11 = sphi %s968_s11, %s1375_s11   ;;  %s916_s10 = sphi %s966_s10, %s1374_s10   ;;  %s912_s9 = sphi %s964_s9, %s1373_s9  }
   0x9   : > { %s33_s17 = sadd.s32 1, %s928_s13  ;;  %s42_s18 = sadd.s32 1, %s920_s11 }
   0xa   : > { %p35_p0 = scmp.ge.s32.totalorder %s33_s17, 2  ;;  %p49_p1 = scmp.ne.s32.totalorder %s920_s11, %s916_s10 }
   0xb   : > { %p50_p2 = scmp.eq.s32.totalorder %s932_s14, 0  ;;  %p55_p3 = scmp.ne.s32.totalorder %s916_s10, %s912_s9 }
   0xc   : > { %s1379_s17 = smov (%p35_p0, %s33_s17), 0  ;;  %p56_p5 = scmp.eq.s32.totalorder %s666_s15, 0 }
   0xd   : > { %p1005_p4 = por %p50_p2, %p49_p1  ;;  %s37_s20 = ssub.s32 %s928_s13, %s1379_s17 }
   0xe   : > { %p107_p6 = scmp.eq.s32.totalorder %s666_s15, 1  ;;  %p40_p7 = scmp.eq.s32.totalorder %s37_s20, 0 }
   0xf   : > { %p1011_p8 = por %p56_p5, %p55_p3  ;;  %p113_p10 = scmp.eq.s32.totalorder %s667_s16, 1 }
  0x10   : > { %p1015_p9 = por %p107_p6, %p49_p1  ;;  %p723_p13 = scmp.lt.s32.totalorder %s932_s14, 2 }
  0x11   : > { %s1350_s21 = scalar_select %p1011_p8, 1, 0 }
  0x12   : > { %s1351_s22 = scalar_select %p1015_p9, 1, 0 }
  0x13   : > { %s1020_s23 = scalar_select %p40_p7, %s920_s11, %s42_s18  }
  0x14   : > { %p1022_p11 = por %p113_p10, %p55_p3  ;;  %s1029_s25 = sand.u32 1, %s920_s11  }
  0x15   : > { %s670_s26 = sshll.u32 %s1029_s25, 3  ;;  %s703_s27 = sshll.u32 %s928_s13, 7 }
  0x16   : > { %s1352_s24 = scalar_select %p1022_p11, 1, 0 }
  0x17   : > { %s1036_s30 = scalar_lea.hbm %s1344_s0, %s703_s27  ;;  %s137_s3 = scalar_lea.vmem [#allocation2], %s670_s26 }
  0x18   : > { %s147_s4 = sshll.u32 %s137_s3, 4  ;;  %p1044_p0 = pnand %p723_p13, %p1005_p4  ;;  %s1040_s4 = int_to_ptr.vmem [resolvable:$true] %s147_s4 }
  0x19   : > { %s1051_s8 = scalar_lea.hbm %s1345_s1, %s703_s27  ;;  %s134_s15 = scalar_lea.sflag [#allocation3], %s1029_s25 }
  0x1a   : > { %s786_s16 = scalar_lea.hbm %s1036_s30, 128  ;;  %p788_p2 = pneg %p1044_p0 }
  0x1b   : > { %p787_p1 = scmp.ne.s32.totalorder %s1036_s30, %s786_s16  ;;  %s791_s20 = scalar_lea.hbm %s1344_s0, 256 }
  0x1c   : > { %p792_p4 = scmp.lt.u32.totalorder %s1036_s30, %s1344_s0  ;;  %p793_p6 = scmp.lt.u32.totalorder %s791_s20, %s786_s16 }
  0x1d   : > { %p789_p3 = pnand %p788_p2, %p787_p1  ;;  %p795_p10 = scmp.lt.u32.totalorder %s786_s16, %s1036_s30 }
  0x1e   : > { %p794_p7 = por %p793_p6, %p792_p4 }
  0x1f   : > { %p790_p5 = pneg %p789_p3 }
  0x20   : > { %p796_p13 = por %p795_p10, %p794_p7 }
  0x22   : > { %p797_p12 = pnand %p796_p13, %p790_p5 }
  0x24   : > { %800 = shalt.err (!%p797_p12)
}
  0x25   : > { %s801_s27 = scalar_lea.vmem %s1040_s4, 128  ;;  %s934_s3 = smov [#allocation2]  }
  0x26   : > { %p802_p1 = scmp.ne.s32.totalorder %s1040_s4, %s801_s27  ;;  %s806_s6 = sshll.u32 %s934_s3, 4  ;;  %s807_s6 = int_to_ptr.vmem [resolvable:$false] %s806_s6 }
  0x27   : > { %s808_s7 = scalar_lea.vmem %s807_s6, 256  ;;  %p809_p9 = scmp.lt.s32.totalorder %s1040_s4, %s807_s6 }
  0x28   : > { %p804_p3 = pnand %p802_p1, %p788_p2  ;;  %p810_p4 = scmp.lt.s32.totalorder %s808_s7, %s801_s27 }
  0x2a   : > { %p805_p11 = pneg %p804_p3  ;;  %p811_p6 = por %p810_p4, %p809_p9 }
  0x2c   : > { %p812_p7 = pnand %p811_p6, %p805_p11 }
  0x2e   : > { %815 = shalt.err (!%p812_p7)
}
  0x2f   : > { %715 = dma.hbm_to_vmem [thread:$0]  (!%p1044_p0), %s1036_s30, 128, %s1040_s4, %s134_s15  }
  0x30   : > { %s158_s16 = scalar_lea.vmem [#allocation5], %s670_s26  ;;  %p676_p9 = scmp.ge.s32.totalorder %s932_s14, 1 }
  0x31   : > { %s165_s18 = sshll.u32 %s158_s16, 4  ;;  %p173_p11 = scmp.lt.s32.totalorder %s932_s14, 3  ;;  %s1082_s18 = int_to_ptr.vmem [resolvable:$true] %s165_s18 }
  0x32   : > { %s155_s20 = scalar_lea.sflag [#allocation6], %s1029_s25  ;;  %s816_s28 = scalar_lea.hbm %s1051_s8, 128 }
  0x33   : > { %p1085_p12 = pnand %p676_p9, %p173_p11  ;;  %p817_p5 = scmp.ne.s32.totalorder %s1051_s8, %s816_s28 }
  0x34   : > { %s821_s26 = scalar_lea.hbm %s1345_s1, 256  ;;  %p822_p1 = scmp.lt.u32.totalorder %s1051_s8, %s1345_s1 }
  0x35   : > { %p819_p10 = pnand %p817_p5, %p788_p2  ;;  %p823_p3 = scmp.lt.u32.totalorder %s821_s26, %s816_s28 }
  0x36   : > { %p825_p6 = scmp.lt.u32.totalorder %s816_s28, %s1051_s8 }
  0x37   : > { %p820_p13 = pneg %p819_p10  ;;  %p824_p4 = por %p823_p3, %p822_p1 }
  0x39   : > { %p826_p7 = por %p825_p6, %p824_p4 }
  0x3b   : > { %p827_p9 = pnand %p826_p7, %p820_p13 }
  0x3d   : > { %830 = shalt.err (!%p827_p9)
}
  0x3e   : > { %s831_s27 = scalar_lea.vmem %s1082_s18, 128  ;;  %s935_s3 = smov [#allocation5]  }
  0x3f   : > { %p832_p11 = scmp.ne.s32.totalorder %s1082_s18, %s831_s27  ;;  %s836_s6 = sshll.u32 %s935_s3, 4  ;;  %s837_s6 = int_to_ptr.vmem [resolvable:$false] %s836_s6 }
  0x40   : > { %s838_s7 = scalar_lea.vmem %s837_s6, 256  ;;  %p839_p8 = scmp.lt.s32.totalorder %s1082_s18, %s837_s6 }
  0x41   : > { %p834_p5 = pnand %p832_p11, %p788_p2  ;;  %p840_p1 = scmp.lt.s32.totalorder %s838_s7, %s831_s27 }
  0x43   : > { %p835_p10 = pneg %p834_p5  ;;  %p841_p3 = por %p840_p1, %p839_p8 }
  0x45   : > { %p842_p4 = pnand %p841_p3, %p835_p10 }
  0x47   : > { %845 = shalt.err (!%p842_p4)
}
  0x48   : > { %s936_s16 = smov 64   ;;  %s937_s28 = smov 4  }
  0x49   : > { %718 = dma.hbm_to_vmem [thread:$0]  (!%p1044_p0), %s1051_s8, 128, %s1082_s18, %s155_s20, %s936_s16, %s936_s16, %s937_s28  }
  0x4a   : > { %177 = sbr.rel (%p1085_p12) target bundleno = 249 (0xf9), region = 28  ;;  %s1118_s30 = sand.u32 (!%p1085_p12), 1, %s916_s10  }
  0x4b   : > { %s1121_s4 = sshll.u32 (!%p1085_p12), %s1118_s30, 3  ;;  %s180_s26 = scalar_lea.sflag (!%p1085_p12), [#allocation3], %s1118_s30 }
  0x4c   : > { %s183_s15 = scalar_lea.vmem (!%p1085_p12), [#allocation2], %s1121_s4  ;;  %p1355_p8 = scmp.ne.s32.totalorder (!%p1085_p12), %s1350_s21, 0 }
  0x51   : > { %899 = dma.done.wait (%p1355_p8), %s180_s26, 128  }
  0x52   : > { %901 = vsyncadd (%p1355_p8), %s180_s26, 4294967168  ;;  %s189_s25 = scalar_lea.sflag [#allocation6], %s1118_s30  ;;  %s192_s5 = scalar_lea.vmem [#allocation5], %s1121_s4 }
  0x53   : > { %903 = dma.done.wait (%p1355_p8), %s189_s25, 128  }
  0x54   : > { %905 = vsyncadd (%p1355_p8), %s189_s25, 4294967168  ;;  %v1135_v0 = vld [vmem:[%s183_s15] sm:$0xff]  ;;  %s938_s8 = smov 16   ;;  %s939_s18 = smov 17   ;;  %v225_v2 = vlaneseq  ;;  %v221_v7 = vld [vmem:[%s192_s5] sm:$0xf] }
  0x55   : > { %287 = vrot.lane.b32.xlu1 %v1135_v0, %s938_s8  ;;  %254 = vrot.lane.b32.xlu0 %v1135_v0, %s939_s18  ;;  %v253_v1 = vcombine.high %v1135_v0, %v1135_v0  ;;  %s940_s19 = smov 15   ;;  %s941_s20 = smov 1   ;;  %vm223_vm4 = vnez %v221_v7  ;;  %v946_v8 = vmov 0   ;;  %v947_v30 = vmov 0.0   ;;  %v222_v46 = vld [vmem:[%s192_s5 + $0x4] sm:$0x5] }
  0x56   : > { %s942_s21 = smov 127   ;;  %s943_s29 = smov 113   ;;  %v226_v3 = vand.u32 127, %v225_v2  ;;  %v296_v9 = vsel %vm223_vm4, 16843009, %v946_v8  ;;  %v278_v24 = vshrl.u32 %v225_v2, 7 }
  0x57   : > { %s944_s27 = smov 112   ;;  %s945_s3 = smov 111   ;;  %v297_v11 = vunpack.c.0.s8 %v296_v9  ;;  %v298_v12 = vunpack.c.1.s8 %v296_v9 }
  0x58   : > { %v227_v4 = vadd.s32 128, %v226_v3  ;;  %v232_v5 = vand.u32 15, %v226_v3  ;;  %v1191_v34 = vsub.s32 0, %v278_v24  ;;  %s705_s6 = sshll.u32 %s924_s12, 7  ;;  %s217_s7 = scalar_lea.vmem [#allocation7], %s1121_s4 }
  0x59   : > { %323 = vrot.lane.b32.xlu0 %v1135_v0, %s940_s19  ;;  %289 = vrot.lane.b32.xlu1 %v253_v1, %s938_s8  ;;  %vm299_vm11 = vcmp.ne.s32.totalorder %v297_v11, 0  ;;  %vm300_vm12 = vcmp.ne.s32.totalorder %v298_v12, 0  ;;  %s559_s16 = sshll.u32 %s217_s7, 4  ;;  %s1295_s15 = scalar_lea.hbm %s1346_s2, %s705_s6  ;;  %s1297_s16 = int_to_ptr.vmem [resolvable:$true] %s559_s16 }
  0x5a   : > { %v239_v6 = vand.u32 15, %v227_v4  ;;  %vm332_vm0 = vcmp.lt.s32.totalorder %v232_v5, 15  ;;  %vm263_vm2 = vcmp.ge.s32.totalorder %v232_v5, 1  ;;  %v1159_v16 = vsel %vm299_vm11, 1, %v946_v8  ;;  %s543_s25 = scalar_lea.sflag [#allocation4], %s1118_s30  ;;  %s846_s5 = scalar_lea.vmem %s1297_s16, 128 }
  0x5b   : > { %v1162_v17 = vsel %vm300_vm12, 1, %v946_v8  ;;  %v393_v19 = vrot.slane %v1159_v16, 4  ;;  %v303_v27 = vrot.slane %v1159_v16, 1  ;;  %vm327_vm11 = vcmask 121856   ;;  %p847_p0 = scmp.ne.s32.totalorder %s1297_s16, %s846_s5  ;;  %p1370_p2 = scmp.ne.s32.totalorder %s1351_s22, 0 }
  0x5c   : > { %vm333_vm1 = vcmp.lt.s32.totalorder %v239_v6, 15  ;;  %vm264_vm3 = vcmp.ge.s32.totalorder %v239_v6, 1  ;;  %v394_v20 = vrot.slane %v1162_v17, 4  ;;  %v304_v32 = vrot.slane %v1162_v17, 1  ;;  %s948_s12 = smov [#allocation7]  }
  0x5d   : > { %325 = vrot.lane.b32.xlu1 %v253_v1, %s940_s19  ;;  %256 = vrot.lane.b32.xlu0 %v253_v1, %s939_s18  ;;  %vm334_vm5 = vmpackc.low %vm333_vm1, %vm332_vm0  ;;  %vm395_vm15 = vcmp.ne.s32.totalorder %v393_v19, 0  ;;  %v487_v7 = vrot.slane %v1162_v17, 7  ;;  %p848_p12 = pnand %p847_p0, %p1370_p2  ;;  %s850_s4 = sshll.u32 %s948_s12, 4  ;;  %s851_s4 = int_to_ptr.vmem [resolvable:$false] %s850_s4 }
  0x5e   : > { %vm265_vm6 = vmpackc.low %vm264_vm3, %vm263_vm2  ;;  %vm396_vm0 = vcmp.ne.s32.totalorder %v394_v20, 0  ;;  %v688_v31 = vsel %vm395_vm15, 1.0, %v947_v30  ;;  %vm305_vm3 = vcmp.ne.s32.totalorder %v303_v27, 0  ;;  %vm224_vm15 = vnez %v222_v46  ;;  %s852_s8 = scalar_lea.vmem %s851_s4, 256  ;;  %p853_p6 = scmp.lt.s32.totalorder %s1297_s16, %s851_s4 }
  0x5f   : > { %vm1150_vm7 = vmpackc.even %vm334_vm5, %vm334_vm5  ;;  %v689_v33 = vsel %vm396_vm0, 1.0, %v947_v30  ;;  %v404_v39 = vrot.slane %v688_v31, %v1191_v34  ;;  %vm291_vm5 = vcmask 130048   ;;  %v682_v42 = vsel %vm305_vm3, 1.0, %v947_v30  ;;  %p849_p13 = pneg %p848_p12  ;;  %p854_p7 = scmp.lt.s32.totalorder %s852_s8, %s846_s5 }
  0x60   : > { %vm266_vm8 = vmpackc.even %vm265_vm6, %vm265_vm6  ;;  %v408_v40 = vrot.slane %v689_v33, %v1191_v34  ;;  %vm258_vm6 = vcmask 138240   ;;  %v314_v55 = vrot.slane %v682_v42, %v1191_v34  ;;  %vm1249_vm3 = vcmp.ne.s32.totalorder %v487_v7, 0 }
  0x61   : > { %366 = vrot.lane.b32.xlu1 %v253_v1, %s941_s20  ;;  %364 = vrot.lane.b32.xlu0 %v1135_v0, %s941_s20  ;;  %vm336_vm9 = vmand %vm223_vm4, %vm1150_vm7  ;;  %p855_p9 = por %p854_p7, %p853_p6 }
  0x62   : > { %vm267_vm10 = vmand %vm223_vm4, %vm266_vm8  ;;  %v337_v13 = vsel %vm336_vm9, 16843009, %v946_v8  ;;  %vm306_vm4 = vcmp.ne.s32.totalorder %v304_v32, 0  ;;  %v411_v49 = vcombine.low %v404_v39, %v408_v40 }
  0x63   : > { %v268_v14 = vsel %vm267_vm10, 16843009, %v946_v8  ;;  %v338_v15 = vunpack.c.0.s8 %v337_v13  ;;  %v339_v22 = vunpack.c.1.s8 %v337_v13  ;;  %v683_v47 = vsel %vm306_vm4, 1.0, %v947_v30  ;;  %vm515_vm0 = vmand %vm224_vm15, %vm1150_vm7  ;;  %p856_p11 = pnand %p855_p9, %p849_p13 }
  0x64   : > { %v270_v18 = vunpack.c.1.s8 %v268_v14  ;;  %v269_v21 = vunpack.c.0.s8 %v268_v14  ;;  %v318_v57 = vrot.slane %v683_v47, %v1191_v34  ;;  %v1220_v63 = vmul.f32 %v411_v49, %v1135_v0 }
  0x65   : > { %421 = vrot.lane.b32.xlu1 %v253_v1, %s942_s21  ;;  %419 = vrot.lane.b32.xlu0 %v1135_v0, %s942_s21  ;;  %vm340_vm13 = vcmp.ne.s32.totalorder %v338_v15, 0  ;;  %vm341_vm2 = vcmp.ne.s32.totalorder %v339_v22, 0  ;;  %v486_v14 = vrot.slane %v1159_v16, 7  ;;  %v516_v19 = vsel %vm515_vm0, 16843009, %v946_v8 }
  0x66   : > { %vm1166_vm14 = vcmp.ne.s32.totalorder %v270_v18, 0  ;;  %vm1170_vm1 = vcmp.ne.s32.totalorder %v269_v21, 0  ;;  %v1175_v26 = vsel %vm340_vm13, 1, %v946_v8  ;;  %v343_v36 = vsel %vm341_vm2, 1, %v946_v8 }
  0x67   : > { %v1181_v28 = vsel %vm1170_vm1, 1, %v946_v8  ;;  %v1186_v29 = vsel %vm1166_vm14, 1, %v946_v8  ;;  %v344_v35 = vrot.slane %v1175_v26, 2  ;;  %v345_v41 = vrot.slane %v343_v36, 2 }
  0x68   : > { %v373_v37 = vrot.slane %v1181_v28, 3  ;;  %v374_v38 = vrot.slane %v1186_v29, 3  ;;  %v680_v44 = vsel %vm1170_vm1, 1.0, %v947_v30  ;;  %v681_v48 = vsel %vm1166_vm14, 1.0, %v947_v30 }
  0x69   : > { %450 = vrot.lane.b32.xlu1 %v253_v1, %s943_s29  ;;  %448 = vrot.lane.b32.xlu0 %v1135_v0, %s943_s29  ;;  %vm346_vm8 = vcmp.ne.s32.totalorder %v344_v35, 0  ;;  %v429_v50 = vrot.slane %v343_v36, 5  ;;  %vm347_vm12 = vcmp.ne.s32.totalorder %v345_v41, 0  ;;  %vm368_vm13 = vcmask 7168  }
  0x6a   : > { %vm375_vm9 = vcmp.ne.s32.totalorder %v373_v37, 0  ;;  %vm376_vm10 = vcmp.ne.s32.totalorder %v374_v38, 0  ;;  %v684_v51 = vsel %vm346_vm8, 1.0, %v947_v30  ;;  %v280_v52 = vrot.slane %v680_v44, %v1191_v34 }
  0x6b   : > { %v686_v53 = vsel %vm375_vm9, 1.0, %v947_v30  ;;  %v687_v54 = vsel %vm376_vm10, 1.0, %v947_v30  ;;  %v284_v59 = vrot.slane %v681_v48, %v1191_v34  ;;  %v428_v60 = vrot.slane %v1175_v26, 5 }
  0x6c   : > { %v355_v61 = vrot.slane %v684_v51, %v1191_v34  ;;  %v685_v62 = vsel %vm347_vm12, 1.0, %v947_v30  ;;  %vm431_vm14 = vcmp.ne.s32.totalorder %v429_v50, 0  ;;  %v388_v2 = vrot.slane %v687_v54, %v1191_v34 }
  0x6d   : > { %479 = vrot.lane.b32.xlu1 %v253_v1, %s944_s27  ;;  %477 = vrot.lane.b32.xlu0 %v1135_v0, %s944_s27  ;;  %v458_v3 = vrot.slane %v1186_v29, 6  ;;  %v457_v4 = vrot.slane %v1181_v28, 6  ;;  %v359_v9 = vrot.slane %v685_v62, %v1191_v34  ;;  %v691_v13 = vsel %vm431_vm14, 1.0, %v947_v30 }
  0x6e   : > { %vm430_vm1 = vcmp.ne.s32.totalorder %v428_v60, 0  ;;  %vm1253_vm4 = vcmp.ne.s32.totalorder %v486_v14, 0  ;;  %v518_v35 = vunpack.c.1.s8 %v516_v19  ;;  %v517_v36 = vunpack.c.0.s8 %v516_v19 }
  0x6f   : > { %v690_v23 = vsel %vm430_vm1, 1.0, %v947_v30  ;;  %vm1241_vm7 = vcmp.ne.s32.totalorder %v458_v3, 0  ;;  %vm1245_vm2 = vcmp.ne.s32.totalorder %v457_v4, 0  ;;  %v415_v42 = vcombine.high %v1220_v63, %v1220_v63 }
  0x70   : > { %v693_v46 = vsel %vm1241_vm7, 1.0, %v947_v30  ;;  %v439_v47 = vrot.slane %v690_v23, %v1191_v34  ;;  %v692_v48 = vsel %vm1245_vm2, 1.0, %v947_v30  ;;  %v695_v49 = vsel %vm1249_vm3, 1.0, %v947_v30 }
  0x71   : > { %508 = vrot.lane.b32.xlu1 %v253_v1, %s945_s3  ;;  %506 = vrot.lane.b32.xlu0 %v1135_v0, %s945_s3  ;;  %v384_v1 = vrot.slane %v686_v53, %v1191_v34  ;;  %v694_v50 = vsel %vm1253_vm4, 1.0, %v947_v30  ;;  %vm520_vm8 = vcmp.ne.s32.totalorder %v518_v35, 0  ;;  %vm519_vm9 = vcmp.ne.s32.totalorder %v517_v36, 0 }
  0x72   : > { %vm481_vm10 = vcmask 916480   ;;  %v497_v60 = vrot.slane %v694_v50, %v1191_v34 }
  0xc7   : > { %v288_v43 = vpop.permute.xlu1 %287  ;;  %v255_v45 = vpop.permute.xlu0 %254 }
  0xc8   : > { %v295_v5 = vsel %vm291_vm5, 0.0, %v288_v43  ;;  %v262_v6 = vsel %vm258_vm6, 0.0, %v255_v45 }
  0xc9   : > { %v319_v20 = vmul.f32 %v314_v55, %v295_v5  ;;  %v285_v21 = vmul.f32 %v280_v52, %v262_v6  ;;  %v472_v55 = vrot.slane %v693_v46, %v1191_v34 }
  0xcb   : > { %v324_v56 = vpop.permute.xlu0 %323  ;;  %v290_v58 = vpop.permute.xlu1 %289  ;;  %v321_v37 = vmax.f32 %v285_v21, %v319_v20 }
  0xcc   : > { %v292_v0 = vsel %vm291_vm5, %v288_v43, %v290_v58  ;;  %v331_v10 = vsel %vm327_vm11, 0.0, %v324_v56  ;;  %vm423_vm5 = vcmask 1039360   ;;  %v443_v43 = vrot.slane %v691_v13, %v1191_v34 }
  0xcd   : > { %v320_v17 = vmul.f32 %v318_v57, %v292_v0  ;;  %v360_v26 = vmul.f32 %v355_v61, %v331_v10  ;;  %v468_v57 = vrot.slane %v692_v48, %v1191_v34 }
  0xcf   : > { %v326_v11 = vpop.permute.xlu1 %325  ;;  %v257_v12 = vpop.permute.xlu0 %256  ;;  %v362_v41 = vmax.f32 %v321_v37, %v360_v26 }
  0xd0   : > { %v328_v15 = vsel %vm327_vm11, %v324_v56, %v326_v11  ;;  %v259_v18 = vsel %vm258_vm6, %v255_v45, %v257_v12  ;;  %vm452_vm6 = vcmask 924672   ;;  %vm510_vm11 = vcmask 908288  }
  0xd1   : > { %v286_v22 = vmul.f32 %v284_v59, %v259_v18  ;;  %v361_v8 = vmul.f32 %v359_v9, %v328_v15  ;;  %v501_v59 = vrot.slane %v695_v49, %v1191_v34 }
  0xd3   : > { %v322_v27 = vmax.f32 %v286_v22, %v320_v17  ;;  %v367_v28 = vpop.permute.xlu1 %366  ;;  %v365_v29 = vpop.permute.xlu0 %364 }
  0xd4   : > { %v369_v32 = vsel %vm368_vm13, %v365_v29, %v367_v28  ;;  %v372_v33 = vsel %vm368_vm13, 0.0, %v365_v29 }
  0xd5   : > { %v363_v38 = vmax.f32 %v322_v27, %v361_v8  ;;  %v389_v39 = vmul.f32 %v384_v1, %v372_v33  ;;  %v390_v40 = vmul.f32 %v388_v2, %v369_v32  ;;  %v697_v1 = vsel %vm520_vm8, 1.0, %v947_v30 }
  0xd6   : > { %v696_v2 = vsel %vm519_vm9, 1.0, %v947_v30  ;;  %v532_v14 = vrot.slane %v697_v1, %v1191_v34 }
  0xd7   : > { %v422_v44 = vpop.permute.xlu1 %421  ;;  %v420_v45 = vpop.permute.xlu0 %419  ;;  %v391_v51 = vmax.f32 %v362_v41, %v389_v39  ;;  %v392_v52 = vmax.f32 %v363_v38, %v390_v40  ;;  %v528_v10 = vrot.slane %v696_v2, %v1191_v34 }
  0xd8   : > { %v427_v53 = vsel %vm423_vm5, %v422_v44, 0.0  ;;  %v424_v54 = vsel %vm423_vm5, %v420_v45, %v422_v44 }
  0xd9   : > { %v418_v3 = vmax.f32 %v392_v52, %v415_v42  ;;  %v445_v4 = vmul.f32 %v443_v43, %v427_v53  ;;  %v417_v5 = vmax.f32 %v391_v51, %v1220_v63  ;;  %v444_v6 = vmul.f32 %v439_v47, %v424_v54 }
  0xdb   : > { %v451_v56 = vpop.permute.xlu1 %450  ;;  %v449_v58 = vpop.permute.xlu0 %448  ;;  %v447_v30 = vmax.f32 %v418_v3, %v445_v4  ;;  %v446_v15 = vmax.f32 %v417_v5, %v444_v6 }
  0xdc   : > { %v456_v61 = vsel %vm452_vm6, %v451_v56, 0.0  ;;  %v453_v62 = vsel %vm452_vm6, %v449_v58, %v451_v56 }
  0xdd   : > { %v474_v0 = vmul.f32 %v472_v55, %v456_v61  ;;  %v473_v7 = vmul.f32 %v468_v57, %v453_v62 }
  0xdf   : > { %v480_v9 = vpop.permute.xlu1 %479  ;;  %v478_v11 = vpop.permute.xlu0 %477  ;;  %v476_v19 = vmax.f32 %v447_v30, %v474_v0  ;;  %v475_v20 = vmax.f32 %v446_v15, %v473_v7 }
  0xe0   : > { %v485_v12 = vsel %vm481_vm10, %v480_v9, 0.0  ;;  %v482_v13 = vsel %vm481_vm10, %v478_v11, %v480_v9 }
  0xe1   : > { %v503_v18 = vmul.f32 %v501_v59, %v485_v12  ;;  %v502_v63 = vmul.f32 %v497_v60, %v482_v13 }
  0xe3   : > { %v509_v21 = vpop.permute.xlu1 %508  ;;  %v507_v17 = vpop.permute.xlu0 %506  ;;  %v505_v24 = vmax.f32 %v476_v19, %v503_v18  ;;  %v504_v16 = vmax.f32 %v475_v20, %v502_v63 }
  0xe4   : > { %v514_v22 = vsel %vm510_vm11, %v509_v21, 0.0  ;;  %v511_v23 = vsel %vm510_vm11, %v507_v17, %v509_v21 }
  0xe5   : > { %v534_v25 = vmul.f32 %v532_v14, %v514_v22  ;;  %v533_v26 = vmul.f32 %v528_v10, %v511_v23 }
  0xe7   : > { %v536_v34 = vmax.f32 %v505_v24, %v534_v25  ;;  %v535_v8 = vmax.f32 %v504_v16, %v533_v26 }
  0xe9   : > { %v539_v27 = vcombine.low %v535_v8, %v536_v34 }
  0xeb   : > { %541 = vst [vmem:[%s217_s7] sm:$0xff] %v539_v27 }
  0xec   : > { %859 = shalt.err (!%p856_p11)
}
  0xed   : > { %s860_s30 = scalar_lea.hbm %s1295_s15, 128  ;;  %s864_s20 = scalar_lea.hbm %s1346_s2, 256 }
  0xee   : > { %p861_p5 = scmp.ne.s32.totalorder %s1295_s15, %s860_s30  ;;  %p865_p3 = scmp.lt.u32.totalorder %s1295_s15, %s1346_s2 }
  0xef   : > { %p866_p4 = scmp.lt.u32.totalorder %s864_s20, %s860_s30  ;;  %p868_p0 = scmp.lt.u32.totalorder %s860_s30, %s1295_s15 }
  0xf0   : > { %p862_p10 = pnand %p861_p5, %p1370_p2 }
  0xf1   : > { %p867_p8 = por %p866_p4, %p865_p3 }
  0xf2   : > { %p863_p1 = pneg %p862_p10 }
  0xf3   : > { %p869_p12 = por %p868_p0, %p867_p8 }
  0xf5   : > { %p870_p13 = pnand %p869_p12, %p863_p1 }
  0xf7   : > { %873 = shalt.err (!%p870_p13)
}
  0xf8   : > { %710 = dma.vmem_to_hbm [thread:$0]  (%p1370_p2), %s1297_s16, 128, %s1295_s15, %s543_s25  }
  0xf9 PF: > { %s571_s27 = sand.u32 1, %s912_s9   ;;  %p1371_p6 = scmp.ne.s32.totalorder %s1352_s24, 0 }
  0xfa   : > { %p1372_p7 = scmp.ge.s32.totalorder %s932_s14, 2  ;;  %s572_s3 = scalar_lea.sflag [#allocation4], %s571_s27 }
  0xfc   : > { %p720_p9 = pnand %p1372_p7, %p1371_p6 }
  0xfe   : > { %907 = dma.done.wait (!%p720_p9), %s572_s3, 128  }
  0xff   : > { %909 = vsyncadd (!%p720_p9), %s572_s3, 4294967168  ;;  %s21_s14 = sadd.s32 1, %s932_s14   ;;  %s1373_s9 = smov %s916_s10 }
 0x100   : > { %p18_p11 = scmp.ge.s32.totalorder %s21_s14, 4   ;;  %s1374_s10 = smov %s920_s11 }
 0x101   : > { %s1375_s11 = smov %s1020_s23  ;;  %s1376_s12 = smov %s928_s13 }
 0x102   : > { %s1377_s13 = smov %s1379_s17  ;;  %20 = sbr.rel (!%p18_p11) target bundleno = 8 (0x8), region = 86 }
 0x109   :  { %577 = vsyncpa [#allocation3], 1 }
 0x10a   :  { %579 = vsyncpa [#allocation3 + $0x1], 1 }
 0x10b   :  { %580 = vsyncpa [#allocation6], 1 }
 0x10c   :  { %582 = vsyncpa [#allocation6 + $0x1], 1 }
 0x10d   :  { %583 = vsyncpa [#allocation4], 1 }
 0x10e   :  { %585 = vsyncpa [#allocation4 + $0x1], 1 }

</bundles_post_ra>
